<compile_context>
chip_gen: v7x
topology: tpu7x:2x2x1
jax: 0.10.0
libtpu: 0.0.40
codegen_flags: <defaults>
</compile_context>

<pallas_src>
import functools

import numpy as np

import jax
import jax.numpy as jnp
from jax.experimental import pallas as pl
from jax.experimental.pallas import tpu as pltpu


_CODE_GRANULARITY = 32  # int8 packs 4 rows/sublane -> natural (32, 128) tile


def _rank_loss_kernel(pred_ref, code_ref, out_ref, *, num_strong, ragged):
    """One batch tile: unweighted partial listwise distillation rank loss."""
    # pred may be stored narrow (bf16) in HBM; upcast right after load, keep f32 math.
    pred = pred_ref[...].astype(jnp.float32)          # (TB, N)
    # code is stored int8 in HBM (1 B/elem DMA); compares are done in int32.
    code = code_ref[...].astype(jnp.int32)            # (TB, N)

    strong_mask = code < num_strong                   # rank-coded strong entries
    weak_mask = code == num_strong
    no_mask = code == num_strong + 1

    logp = jnp.log(pred)                              # EUP, f32 for precision near 0
    # strong_above + weak_above merged: codes <= num_strong are strong-or-weak.
    above = jnp.sum(jnp.where(code <= num_strong, logp, 0.0))

    w_sum = jnp.sum(jnp.where(weak_mask, pred, 0.0), axis=-1, keepdims=True)  # (TB,1)
    n_sum = jnp.sum(jnp.where(no_mask, pred, 0.0), axis=-1, keepdims=True)    # (TB,1)
    base = w_sum + n_sum

    # Hoisted: non-strong codes are >= num_strong, so inside the loop a single
    # where(code >= i, strong_pred, 0) keeps exactly the rank >= i strong entries.
    strong_pred = jnp.where(strong_mask, pred, 0.0)

    if ragged:
        s_cnt = jnp.sum(strong_mask.astype(jnp.int32), axis=-1, keepdims=True)

    strong_log_terms = jnp.zeros_like(base)
    # Static unroll over the (small) strong-list length.  suffix_i = sum of strong
    # predictions whose rank in the ordered strong list is >= i, i.e. exactly the
    # entries of strong.flip(0).cumsum(0) in the reference (order preserved via ranks).
    for i in range(num_strong):
        masked = strong_pred if i == 0 else jnp.where(code >= i, strong_pred, 0.0)
        suffix_i = jnp.sum(masked, axis=-1, keepdims=True)          # (TB, 1)
        term = jnp.log(suffix_i + base)
        if ragged:
            # Keep this a select: term can be log(0) = -inf on rows with s_cnt <= i
            # (or on padded rows); a multiplicative gate would produce NaNs.
            term = jnp.where(s_cnt > i, term, 0.0)
        strong_log_terms = strong_log_terms + term

    total = jnp.sum(strong_log_terms + n_sum) - above
    # Lane-dense (unmasked) store of the tile's partial loss.
    out_ref[...] = jnp.broadcast_to(total, (1, 8, 128))


def build_partition_code_map(strong_idx, weak_idx, no_idx, batch_size, num_preds):
    """Dense (batch, N) code map (int8 when it fits, else int32).

    0..S-1 : rank of the element inside the (ordered) strong list
    S      : weak,   S + 1 : no,   S + 2 : not in any partition / padding
    Index values < 0 mark padding and are ignored.

    The map is pure metadata: when the partitions are static across training steps,
    build it once and pass it to distill_rank_loss_listwise via `code_map=` to avoid
    re-doing a full (B, N) HBM pass per call.
    """
    num_strong = strong_idx.shape[1]
    code_dtype = jnp.int8 if num_strong + 2 <= 127 else jnp.int32
    code = jnp.full((batch_size, num_preds), num_strong + 2, dtype=code_dtype)
    rows = jnp.arange(batch_size, dtype=jnp.int32)[:, None]

    def scatter(cmap, idx, vals):
        idx = idx.astype(jnp.int32)
        cols = jnp.where(idx >= 0, idx, num_preds)    # padding -> out-of-bounds -> drop
        return cmap.at[rows, cols].set(vals, mode="drop")

    code = scatter(code, no_idx,
                   jnp.full(no_idx.shape, num_strong + 1, dtype=code_dtype))
    code = scatter(code, weak_idx,
                   jnp.full(weak_idx.shape, num_strong, dtype=code_dtype))
    valid_s = strong_idx >= 0
    s_rank = (jnp.cumsum(valid_s.astype(jnp.int32), axis=1) - 1).astype(code_dtype)
    code = scatter(code, strong_idx, s_rank)
    return code


def _vmem_capacity_bytes():
    """Per-core VMEM capacity (64 MiB on v7x, 128 MiB on v5e/v6e)."""
    try:
        return int(pltpu.get_tpu_info().vmem_capacity_bytes)
    except Exception:
        return 64 * 1024 * 1024   # conservative fallback (v7x per-TensorCore)


def _choose_tile_batch(batch_size, num_preds, pred_itemsize, code_itemsize,
                       vmem_budget_bytes, prefer_min_tiles=4,
                       granularity=_CODE_GRANULARITY):
    """Pick a batch-tile size.

    tile_batch is a multiple of 32 so the int8 code block satisfies the packed
    (32, 128) sublane tile; tiny batches fall back to a single full-array block
    (block dims == array dims is always layout-legal).  The budget counts the
    double-buffered pred+code blocks plus the handful of (TB, N) f32/i32
    temporaries the kernel materializes.  prefer_min_tiles keeps >= 2 grid steps
    so the "parallel" grid axis can shard across both TensorCores on v7x.
    """
    if batch_size <= granularity:
        return batch_size
    per_row = num_preds * (2 * pred_itemsize + 2 * code_itemsize + 6 * 4)
    cap = max(granularity, vmem_budget_bytes // max(per_row, 1))
    target = max(granularity, -(-batch_size // prefer_min_tiles))   # ceil div
    return max(granularity, (min(cap, target) // granularity) * granularity)


def distill_rank_loss_listwise(student_predict_result, strong_idx, weak_idx, no_idx,
                               batch_size, loss_weight=0.1, *,
                               code_map=None, ragged=None, tile_batch=None,
                               prefer_min_tiles=4, input_buffer_count=None):
    """Forward pass of Distill_Rank_Loss_ListWise as a Pallas TPU kernel.

    student_predict_result: flat (batch_size * N,) strictly-positive predictions.
      Any float dtype is accepted (math is f32 in-kernel).  No dtype cast is done
      here: casting an f32 producer to bf16 would add a full HBM read+write pass
      and cancel the kernel-side DMA saving -- store pred in bf16 upstream instead.
    code_map: optional precomputed build_partition_code_map output (cache it when
      the partitions are static across steps).
    ragged: True if strong lists contain -1 padding; None = auto-detect.
    input_buffer_count: optional deeper input pipelining (e.g. 3 on HBM-bound v5e).
    """
    total = student_predict_result.shape[0]
    assert total % batch_size == 0
    num_preds = total // batch_size
    num_strong = strong_idx.shape[1]

    pred = student_predict_result.reshape(batch_size, num_preds)
    code = code_map if code_map is not None else build_partition_code_map(
        strong_idx, weak_idx, no_idx, batch_size, num_preds)
    other_code = num_strong + 2

    if ragged is None:
        try:
            ragged = bool(jnp.any(strong_idx < 0))
        except Exception:          # traced under jit -> take the always-correct path
            ragged = True

    vmem_cap = _vmem_capacity_bytes()
    if tile_batch is None:
        tile_batch = _choose_tile_batch(
            batch_size, num_preds,
            jnp.dtype(pred.dtype).itemsize, jnp.dtype(code.dtype).itemsize,
            vmem_budget_bytes=(vmem_cap * 3) // 8,
            prefer_min_tiles=prefer_min_tiles)

    padded_batch = -(-batch_size // tile_batch) * tile_batch
    if padded_batch != batch_size:
        pad = padded_batch - batch_size
        # Padded rows: pred = 1 (finite log), code = "other" -> zero contribution;
        # the ragged s_cnt gate keeps their log(0) suffix terms out of the sum.
        pred = jnp.concatenate(
            [pred, jnp.ones((pad, num_preds), dtype=pred.dtype)], axis=0)
        code = jnp.concatenate(
            [code, jnp.full((pad, num_preds), other_code, dtype=code.dtype)], axis=0)
        ragged = True
    num_tiles = padded_batch // tile_batch

    def make_in_spec():
        if input_buffer_count is None:
            return pl.BlockSpec((tile_batch, num_preds), lambda b: (b, 0))
        return pl.BlockSpec((tile_batch, num_preds), lambda b: (b, 0),
                            pipeline_mode=pl.Buffered(input_buffer_count))

    kernel = functools.partial(_rank_loss_kernel,
                               num_strong=num_strong, ragged=ragged)
    partials = pl.pallas_call(
        kernel,
        out_shape=jax.ShapeDtypeStruct((num_tiles, 8, 128), jnp.float32),
        grid=(num_tiles,),
        in_specs=[make_in_spec(), make_in_spec()],
        out_specs=pl.BlockSpec((1, 8, 128), lambda b: (b, 0, 0)),
        compiler_params=pltpu.CompilerParams(
            dimension_semantics=("parallel",),
            vmem_limit_bytes=int(vmem_cap // 2),
        ),
    )(pred, code)
    return jnp.sum(partials[:, 0, 0]) * jnp.float32(loss_weight)


def _reference(pred_flat, strong_idx, weak_idx, no_idx, batch_size, loss_weight):
    """Numpy transliteration of the PyTorch forward (handles -1 padded lists)."""
    pred = np.asarray(pred_flat, dtype=np.float64).reshape(batch_size, -1)
    strong_idx = np.asarray(strong_idx)
    weak_idx = np.asarray(weak_idx)
    no_idx = np.asarray(no_idx)
    tot = 0.0
    for b in range(batch_size):
        p = pred[b]
        sv = p[strong_idx[b][strong_idx[b] >= 0]]
        wv = p[weak_idx[b][weak_idx[b] >= 0]]
        nv = p[no_idx[b][no_idx[b] >= 0]]
        strong_above = np.sum(np.log(sv)) if sv.size else 0.0
        weak_above = np.sum(np.log(wv)) if wv.size else 0.0
        strong_below_1 = np.cumsum(sv[::-1])
        strong_below_23 = np.sum(wv) + np.sum(nv)
        strong_loss = np.sum(np.log(strong_below_1 + strong_below_23)) - strong_above
        weak_loss = np.sum(nv) - weak_above
        tot += strong_loss + weak_loss
    return np.float32(tot * loss_weight)


if __name__ == "__main__":
    key = jax.random.PRNGKey(0)
    loss_weight = 0.1  # stands in for config.rank_loss_weight
    num_preds = 256
    S, W, O = 3, 4, 5

    k_pred_a, k_perm_a, k_pred_b, k_perm_b = jax.random.split(key, 4)

    # ---------------- Case A: dense (fixed-length) lists, batch 64 -> 2 tiles ----
    B_a = 64
    pred_a = jax.nn.sigmoid(
        jax.random.normal(k_pred_a, (B_a * num_preds,), dtype=jnp.float32))
    perms_a = jax.vmap(lambda k: jax.random.permutation(k, num_preds))(
        jax.random.split(k_perm_a, B_a))
    strong_a = perms_a[:, :S].astype(jnp.int32)
    weak_a = perms_a[:, S:S + W].astype(jnp.int32)
    no_a = perms_a[:, S + W:S + W + O].astype(jnp.int32)

    loss_a = distill_rank_loss_listwise(pred_a, strong_a, weak_a, no_a,
                                        B_a, loss_weight)
    loss_a = jax.block_until_ready(loss_a)
    ref_a = _reference(pred_a, strong_a, weak_a, no_a, B_a, loss_weight)
    assert jnp.allclose(loss_a, ref_a, rtol=2e-4, atol=1e-3), (loss_a, ref_a)

    # ---------------- Case B: ragged lists + non-divisible batch (40 -> padded) ---
    B_b = 40
    pred_b = jax.nn.sigmoid(
        jax.random.normal(k_pred_b, (B_b * num_preds,), dtype=jnp.float32))
    perms_b = jax.vmap(lambda k: jax.random.permutation(k, num_preds))(
        jax.random.split(k_perm_b, B_b))
    rows_b = jnp.arange(B_b)
    s_valid = jnp.arange(S)[None, :] < (1 + (rows_b % S))[:, None]
    strong_b = jnp.where(s_valid, perms_b[:, :S], -1).astype(jnp.int32)
    weak_b = perms_b[:, S:S + W].astype(jnp.int32)
    n_valid = jnp.arange(O)[None, :] < (O - (rows_b % 2))[:, None]
    no_b = jnp.where(n_valid, perms_b[:, S + W:S + W + O], -1).astype(jnp.int32)

    loss_b = distill_rank_loss_listwise(pred_b, strong_b, weak_b, no_b,
                                        B_b, loss_weight)
    loss_b = jax.block_until_ready(loss_b)
    ref_b = _reference(pred_b, strong_b, weak_b, no_b, B_b, loss_weight)
    assert jnp.allclose(loss_b, ref_b, rtol=2e-4, atol=1e-3), (loss_b, ref_b)

    print("KERNEL_OK")
</pallas_src>

<mosaic_0001>
module attributes {stable_mosaic.version = 11 : i64} {
  func.func @_rank_loss_kernel(%arg0: i32, %arg1: memref<32x256xf32, #tpu.memory_space<vmem>>, %arg2: memref<32x256xi8, #tpu.memory_space<vmem>>, %arg3: memref<1x8x128xf32, #tpu.memory_space<vmem>>) attributes {dimension_semantics = [#tpu.dimension_semantics<parallel>], iteration_bounds = array<i64: 2>, scalar_prefetch = 0 : i64, scratch_operands = 0 : i64, tpu.core_type = #tpu.core_type<tc>, window_params = [{transform_indices = @transform_0, window_bounds = array<i64: 32, 256>}, {transform_indices = @transform_1, window_bounds = array<i64: 32, 256>}, {transform_indices = @transform_2, window_bounds = array<i64: 1, 8, 128>}]} {
    %c0 = arith.constant 0 : index
    %c0_0 = arith.constant 0 : index
    %0 = vector.load %arg1[%c0, %c0_0] : memref<32x256xf32, #tpu.memory_space<vmem>>, vector<32x256xf32>
    %c0_1 = arith.constant 0 : index
    %c0_2 = arith.constant 0 : index
    %1 = vector.load %arg2[%c0_1, %c0_2] : memref<32x256xi8, #tpu.memory_space<vmem>>, vector<32x256xi8>
    %2 = arith.extsi %1 : vector<32x256xi8> to vector<32x256xi32>
    %c3_i32 = arith.constant 3 : i32
    %3 = vector.broadcast %c3_i32 : i32 to vector<32x256xi32>
    %4 = arith.cmpi slt, %2, %3 : vector<32x256xi32>
    %c3_i32_3 = arith.constant 3 : i32
    %5 = vector.broadcast %c3_i32_3 : i32 to vector<32x256xi32>
    %6 = arith.cmpi eq, %2, %5 : vector<32x256xi32>
    %c4_i32 = arith.constant 4 : i32
    %7 = vector.broadcast %c4_i32 : i32 to vector<32x256xi32>
    %8 = arith.cmpi eq, %2, %7 : vector<32x256xi32>
    %9 = math.log %0 : vector<32x256xf32>
    %c3_i32_4 = arith.constant 3 : i32
    %10 = vector.broadcast %c3_i32_4 : i32 to vector<32x256xi32>
    %11 = arith.cmpi sle, %2, %10 : vector<32x256xi32>
    %cst = arith.constant 0.000000e+00 : f32
    %12 = vector.broadcast %cst : f32 to vector<32x256xf32>
    %13 = arith.select %11, %9, %12 : vector<32x256xi1>, vector<32x256xf32>
    %14 = vector.shape_cast %13 : vector<32x256xf32> to vector<1x32x256xf32>
    %cst_5 = arith.constant dense<0.000000e+00> : vector<1xf32>
    %15 = vector.multi_reduction <add>, %14, %cst_5 [1, 2] : vector<1x32x256xf32> to vector<1xf32>
    %16 = vector.shape_cast %15 : vector<1xf32> to vector<1x1x1xf32>
    %17 = vector.extract %16[0, 0, 0] : f32 from vector<1x1x1xf32>
    %cst_6 = arith.constant 0.000000e+00 : f32
    %18 = vector.broadcast %cst_6 : f32 to vector<32x256xf32>
    %19 = arith.select %6, %0, %18 : vector<32x256xi1>, vector<32x256xf32>
    %cst_7 = arith.constant dense<0.000000e+00> : vector<32xf32>
    %20 = vector.multi_reduction <add>, %19, %cst_7 [1] : vector<32x256xf32> to vector<32xf32>
    %21 = vector.shape_cast %20 : vector<32xf32> to vector<32x1xf32>
    %cst_8 = arith.constant 0.000000e+00 : f32
    %22 = vector.broadcast %cst_8 : f32 to vector<32x256xf32>
    %23 = arith.select %8, %0, %22 : vector<32x256xi1>, vector<32x256xf32>
    %cst_9 = arith.constant dense<0.000000e+00> : vector<32xf32>
    %24 = vector.multi_reduction <add>, %23, %cst_9 [1] : vector<32x256xf32> to vector<32xf32>
    %25 = vector.shape_cast %24 : vector<32xf32> to vector<32x1xf32>
    %26 = arith.addf %21, %25 : vector<32x1xf32>
    %cst_10 = arith.constant 0.000000e+00 : f32
    %27 = vector.broadcast %cst_10 : f32 to vector<32x256xf32>
    %28 = arith.select %4, %0, %27 : vector<32x256xi1>, vector<32x256xf32>
    %cst_11 = arith.constant 0.000000e+00 : f32
    %29 = vector.broadcast %cst_11 : f32 to vector<32x1xf32>
    %cst_12 = arith.constant dense<0.000000e+00> : vector<32xf32>
    %30 = vector.multi_reduction <add>, %28, %cst_12 [1] : vector<32x256xf32> to vector<32xf32>
    %31 = vector.shape_cast %30 : vector<32xf32> to vector<32x1xf32>
    %32 = arith.addf %31, %26 : vector<32x1xf32>
    %33 = math.log %32 : vector<32x1xf32>
    %34 = arith.addf %29, %33 : vector<32x1xf32>
    %c1_i32 = arith.constant 1 : i32
    %35 = vector.broadcast %c1_i32 : i32 to vector<32x256xi32>
    %36 = arith.cmpi sge, %2, %35 : vector<32x256xi32>
    %cst_13 = arith.constant 0.000000e+00 : f32
    %37 = vector.broadcast %cst_13 : f32 to vector<32x256xf32>
    %38 = arith.select %36, %28, %37 : vector<32x256xi1>, vector<32x256xf32>
    %cst_14 = arith.constant dense<0.000000e+00> : vector<32xf32>
    %39 = vector.multi_reduction <add>, %38, %cst_14 [1] : vector<32x256xf32> to vector<32xf32>
    %40 = vector.shape_cast %39 : vector<32xf32> to vector<32x1xf32>
    %41 = arith.addf %40, %26 : vector<32x1xf32>
    %42 = math.log %41 : vector<32x1xf32>
    %43 = arith.addf %34, %42 : vector<32x1xf32>
    %c2_i32 = arith.constant 2 : i32
    %44 = vector.broadcast %c2_i32 : i32 to vector<32x256xi32>
    %45 = arith.cmpi sge, %2, %44 : vector<32x256xi32>
    %cst_15 = arith.constant 0.000000e+00 : f32
    %46 = vector.broadcast %cst_15 : f32 to vector<32x256xf32>
    %47 = arith.select %45, %28, %46 : vector<32x256xi1>, vector<32x256xf32>
    %cst_16 = arith.constant dense<0.000000e+00> : vector<32xf32>
    %48 = vector.multi_reduction <add>, %47, %cst_16 [1] : vector<32x256xf32> to vector<32xf32>
    %49 = vector.shape_cast %48 : vector<32xf32> to vector<32x1xf32>
    %50 = arith.addf %49, %26 : vector<32x1xf32>
    %51 = math.log %50 : vector<32x1xf32>
    %52 = arith.addf %43, %51 : vector<32x1xf32>
    %53 = arith.addf %52, %25 : vector<32x1xf32>
    %54 = vector.shape_cast %53 : vector<32x1xf32> to vector<1x32x1xf32>
    %cst_17 = arith.constant dense<0.000000e+00> : vector<1xf32>
    %55 = vector.multi_reduction <add>, %54, %cst_17 [1, 2] : vector<1x32x1xf32> to vector<1xf32>
    %56 = vector.shape_cast %55 : vector<1xf32> to vector<1x1x1xf32>
    %57 = vector.extract %56[0, 0, 0] : f32 from vector<1x1x1xf32>
    %58 = arith.subf %57, %17 : f32
    %59 = vector.broadcast %58 : f32 to vector<1x8x128xf32>
    %c0_18 = arith.constant 0 : index
    %c0_19 = arith.constant 0 : index
    %c0_20 = arith.constant 0 : index
    %60 = vector.load %arg3[%c0_18, %c0_19, %c0_20] : memref<1x8x128xf32, #tpu.memory_space<vmem>>, vector<1x8x128xf32>
    tpu.vector_store %arg3[%c0_18, %c0_19, %c0_20], %59 {strides = array<i32>} : memref<1x8x128xf32, #tpu.memory_space<vmem>>, vector<1x8x128xf32>,
    return
  }
  func.func @transform_0(%arg0: i32) -> (i32, i32) {
    %c0_i32 = arith.constant 0 : i32
    %c0_i32_0 = arith.constant 0 : i32
    return %arg0, %c0_i32 : i32, i32
  }
  func.func @transform_1(%arg0: i32) -> (i32, i32) {
    %c0_i32 = arith.constant 0 : i32
    %c0_i32_0 = arith.constant 0 : i32
    return %arg0, %c0_i32 : i32, i32
  }
  func.func @transform_2(%arg0: i32) -> (i32, i32, i32) {
    %c0_i32 = arith.constant 0 : i32
    %c0_i32_0 = arith.constant 0 : i32
    %c0_i32_1 = arith.constant 0 : i32
    return %arg0, %c0_i32, %c0_i32_0 : i32, i32, i32
  }
}

</mosaic_0001>

<bundles_post_ra>
// kernel: tpu_custom_call.1
= control target key start
LH: loop header
LB: loop body
LE: loop exit
PB: predicated region body
PF: predicated region fallthrough
CT: control target
= control target key end

     0   :  { %7 = vsyncpa [#allocation3], 0  ;;  %s1214_s0 = inlined_call_operand.hbm [shape: f32[64,256], index: 0, kind: input, shape index: {}]   ;;  %s1215_s1 = inlined_call_operand.hbm [shape: s8[64,256], index: 1, kind: input, shape index: {}]   ;;  %s1216_s2 = inlined_call_operand.hbm [shape: f32[2,8,128], index: 2, kind: output, shape index: {}]  }
   0x1   :  { %9 = vsyncpa [#allocation3 + $0x1], 0 }
   0x2   :  { %10 = vsyncpa [#allocation6], 0 }
   0x3   :  { %12 = vsyncpa [#allocation6 + $0x1], 0 }
   0x4   :  { %13 = vsyncpa [#allocation4], 0 }
   0x5   :  { %15 = vsyncpa [#allocation4 + $0x1], 0  ;;  %s861_s9 = smov 0   ;;  %s863_s10 = smov 0  }
   0x6   :  { %s865_s11 = smov 0   ;;  %s867_s12 = smov 0  }
   0x7 LB: > { %s882_s13 = sadd.s32 4294967295, %s839_s12   ;;  %s591_s14 = sadd.s32 4294967294, %s839_s12   ;;  %s839_s12 = sphi %s867_s12, %s1233_s12   ;;  %s835_s11 = sphi %s865_s11, %s1232_s11   ;;  %s831_s10 = sphi %s863_s10, %s1231_s10   ;;  %s827_s9 = sphi %s861_s9, %s1230_s9  }
   0x8   : > { %s886_s15 = sadd.s32 1, %s839_s12   ;;  %s28_s16 = sadd.s32 1, %s835_s11 }
   0x9   : > { %s25_s17 = ssub.s32 %s839_s12, %s886_s15  ;;  %p35_p0 = scmp.ne.s32.totalorder %s835_s11, %s831_s10 }
   0xa   : > { %p26_p1 = scmp.eq.s32.totalorder %s25_s17, 0  ;;  %p36_p2 = scmp.eq.s32.totalorder %s839_s12, 0 }
   0xb   : > { %p41_p3 = scmp.ne.s32.totalorder %s831_s10, %s827_s9  ;;  %p42_p4 = scmp.eq.s32.totalorder %s882_s13, 0 }
   0xc   : > { %s898_s18 = scalar_select %p26_p1, %s835_s11, %s28_s16  }
   0xd   : > { %p900_p5 = por %p36_p2, %p35_p0  ;;  %p904_p6 = por %p42_p4, %p41_p3 }
   0xe   : > { %p91_p7 = scmp.eq.s32.totalorder %s882_s13, 1  ;;  %p97_p8 = scmp.eq.s32.totalorder %s591_s14, 1 }
   0xf   : > { %s1220_s20 = scalar_select %p904_p6, 1, 0 }
  0x10   : > { %p633_p10 = scmp.lt.s32.totalorder %s839_s12, 2  ;;  %p911_p11 = por %p91_p7, %p35_p0 }
  0x11   : > { %p915_p12 = por %p97_p8, %p41_p3  ;;  %s920_s23 = sand.u32 1, %s835_s11  }
  0x12   : > { %s1221_s21 = scalar_select %p911_p11, 1, 0 }
  0x13   : > { %s1222_s22 = scalar_select %p915_p12, 1, 0 }
  0x14   : > { %s610_s24 = sshll.u32 %s839_s12, 10  ;;  %s594_s25 = sshll.u32 %s920_s23, 6 }
  0x15   : > { %s927_s28 = scalar_lea.hbm %s1214_s0, %s610_s24  ;;  %s121_s29 = scalar_lea.vmem [#allocation2], %s594_s25 }
  0x16   : > { %s129_s30 = sshll.u32 %s121_s29, 4  ;;  %p931_p13 = pnand %p633_p10, %p900_p5  ;;  %s935_s30 = int_to_ptr.vmem [resolvable:$true] %s129_s30 }
  0x17   : > { %s118_s4 = scalar_lea.sflag [#allocation3], %s920_s23  ;;  %s709_s5 = scalar_lea.hbm %s927_s28, 1024 }
  0x18   : > { %p710_p0 = scmp.ne.s32.totalorder %s927_s28, %s709_s5  ;;  %p711_p1 = pneg %p931_p13 }
  0x19   : > { %s714_s8 = scalar_lea.hbm %s1214_s0, 2048  ;;  %p715_p4 = scmp.lt.u32.totalorder %s927_s28, %s1214_s0 }
  0x1a   : > { %p712_p2 = pnand %p711_p1, %p710_p0  ;;  %p716_p5 = scmp.lt.u32.totalorder %s714_s8, %s709_s5 }
  0x1b   : > { %p718_p8 = scmp.lt.u32.totalorder %s709_s5, %s927_s28 }
  0x1c   : > { %p713_p3 = pneg %p712_p2  ;;  %p717_p7 = por %p716_p5, %p715_p4 }
  0x1e   : > { %p719_p10 = por %p718_p8, %p717_p7 }
  0x20   : > { %p720_p9 = pnand %p719_p10, %p713_p3 }
  0x22   : > { %723 = shalt.err (!%p720_p9)
}
  0x23   : > { %s724_s17 = scalar_lea.vmem %s935_s30, 1024  ;;  %s841_s19 = smov [#allocation2]  }
  0x24   : > { %p725_p0 = scmp.ne.s32.totalorder %s935_s30, %s724_s17  ;;  %s729_s24 = sshll.u32 %s841_s19, 4  ;;  %s730_s24 = int_to_ptr.vmem [resolvable:$false] %s729_s24 }
  0x25   : > { %s731_s25 = scalar_lea.vmem %s730_s24, 2048  ;;  %p732_p11 = scmp.lt.s32.totalorder %s935_s30, %s730_s24 }
  0x26   : > { %p727_p2 = pnand %p725_p0, %p711_p1  ;;  %p733_p4 = scmp.lt.s32.totalorder %s731_s25, %s724_s17 }
  0x28   : > { %p728_p12 = pneg %p727_p2  ;;  %p734_p5 = por %p733_p4, %p732_p11 }
  0x2a   : > { %p735_p7 = pnand %p734_p5, %p728_p12 }
  0x2c   : > { %738 = shalt.err (!%p735_p7)
}
  0x2d   : > { %s842_s26 = smov 256   ;;  %s843_s27 = smov 16  }
  0x2e   : > { %625 = dma.hbm_to_vmem [thread:$0]  (!%p931_p13), %s927_s28, 1024, %s935_s30, %s118_s4, %s842_s26, %s842_s26, %s843_s27  }
  0x2f   : > { %p601_p9 = scmp.ge.s32.totalorder %s839_s12, 1  ;;  %p156_p3 = scmp.lt.s32.totalorder %s839_s12, 3 }
  0x30   : > { %s598_s29 = sshll.u32 %s920_s23, 4  ;;  %s611_s6 = sshll.u32 %s839_s12, 8 }
  0x31   : > { %p968_p11 = pnand %p601_p9, %p156_p3  ;;  %s143_s7 = scalar_lea.vmem [#allocation5], %s598_s29 }
  0x32   : > { %s151_s8 = sshll.u32 %s143_s7, 4  ;;  %s976_s17 = scalar_lea.hbm %s1215_s1, %s611_s6  ;;  %s152_s8 = int_to_ptr.vmem [resolvable:$true] %s151_s8 }
  0x33   : > { %s1224_s5 = scalar_select %p968_p11, 1, 0 }
  0x34   : > { %s140_s28 = scalar_lea.sflag [#allocation6], %s920_s23  ;;  %s739_s30 = scalar_lea.hbm %s976_s17, 256 }
  0x35   : > { %p740_p12 = scmp.ne.s32.totalorder %s976_s17, %s739_s30  ;;  %s744_s24 = scalar_lea.hbm %s1215_s1, 512 }
  0x36   : > { %p745_p0 = scmp.lt.u32.totalorder %s976_s17, %s1215_s1  ;;  %p746_p2 = scmp.lt.u32.totalorder %s744_s24, %s739_s30 }
  0x37   : > { %p742_p8 = pnand %p740_p12, %p711_p1  ;;  %p748_p5 = scmp.lt.u32.totalorder %s739_s30, %s976_s17 }
  0x38   : > { %p747_p4 = por %p746_p2, %p745_p0 }
  0x39   : > { %p743_p10 = pneg %p742_p8 }
  0x3a   : > { %p749_p7 = por %p748_p5, %p747_p4 }
  0x3c   : > { %p750_p9 = pnand %p749_p7, %p743_p10 }
  0x3e   : > { %753 = shalt.err (!%p750_p9)
}
  0x3f   : > { %s754_s23 = scalar_lea.vmem %s152_s8, 256  ;;  %s844_s27 = smov [#allocation5]  }
  0x40   : > { %p755_p3 = scmp.ne.s32.totalorder %s152_s8, %s754_s23  ;;  %s759_s29 = sshll.u32 %s844_s27, 4  ;;  %s760_s29 = int_to_ptr.vmem [resolvable:$false] %s759_s29 }
  0x41   : > { %s761_s6 = scalar_lea.vmem %s760_s29, 512  ;;  %p762_p6 = scmp.lt.s32.totalorder %s152_s8, %s760_s29 }
  0x42   : > { %p757_p12 = pnand %p755_p3, %p711_p1  ;;  %p763_p11 = scmp.lt.s32.totalorder %s761_s6, %s754_s23 }
  0x44   : > { %p758_p8 = pneg %p757_p12  ;;  %p764_p0 = por %p763_p11, %p762_p6 }
  0x46   : > { %p765_p2 = pnand %p764_p0, %p758_p8 }
  0x48   : > { %768 = shalt.err (!%p765_p2)
}
  0x49   : > { %628 = dma.hbm_to_vmem [thread:$0]  (!%p931_p13), %s976_s17, 256, %s152_s8, %s140_s28  }
  0x4a   : > { %p1225_p10 = scmp.ne.s32.totalorder %s1224_s5, 0 }
  0x4b   : > { %s1001_s7 = sand.u32 (!%p1225_p10), 1, %s831_s10   ;;  %p1226_p6 = scmp.ne.s32.totalorder (!%p1225_p10), %s1220_s20, 0 }
  0x4c   : > { %160 = sbr.rel (%p1225_p10) target bundleno = 518 (0x206), region = 28  ;;  %s602_s14 = sshll.u32 (!%p1225_p10), %s1001_s7, 6 }
  0x4d   : > { %s163_s16 = scalar_lea.sflag (!%p1225_p10), [#allocation3], %s1001_s7  ;;  %s1005_s30 = scalar_lea.vmem (!%p1225_p10), [#allocation2], %s602_s14 }
  0x53   : > { %814 = dma.done.wait (%p1226_p6), %s163_s16, 1024  }
  0x54   : > { %816 = vsyncadd (%p1226_p6), %s163_s16, 4294966272  ;;  %s603_s3 = sshll.u32 %s1001_s7, 4  ;;  %s172_s5 = scalar_lea.sflag [#allocation6], %s1001_s7 }
  0x55   : > { %s175_s8 = scalar_lea.vmem [#allocation5], %s603_s3 }
  0x56   : > { %818 = dma.done.wait (%p1226_p6), %s172_s5, 256  }
  0x57   : > { %820 = vsyncadd (%p1226_p6), %s172_s5, 4294967040  ;;  %v1017_v0 = vld [vmem:[%s175_s8] sm:$0xff]  ;;  %v1022_v2 = vld [vmem:[%s175_s8 + $0x8] sm:$0xff]  ;;  %s604_s20 = sshll.u32 %s1001_s7, 3  ;;  %s606_s28 = sshll.u32 %s882_s13, 7 }
  0x58   : > { %v1020_v1 = vld [vmem:[%s1005_s30] sm:$0xff]  ;;  %v1025_v3 = vunpack.c.0.s8 %v1017_v0  ;;  %v1028_v4 = vunpack.c.1.s8 %v1017_v0  ;;  %v1031_v5 = vld [vmem:[%s1005_s30 + $0x8] sm:$0xff]  ;;  %v1034_v6 = vunpack.c.0.s8 %v1022_v2  ;;  %v1037_v7 = vunpack.c.1.s8 %v1022_v2  ;;  %v1042_v8 = vld [vmem:[%s1005_s30 + $0x10] sm:$0xff]  ;;  %s200_s4 = scalar_lea.vmem [#allocation7], %s604_s20  ;;  %s1170_s27 = scalar_lea.hbm %s1216_s2, %s606_s28 }
  0x59   : > { %v1046_v9 = vunpack.c.2.s8 %v1017_v0  ;;  %v1052_v11 = vld [vmem:[%s1005_s30 + $0x18] sm:$0xff]  ;;  %v1055_v12 = vunpack.c.2.s8 %v1022_v2  ;;  %v1063_v19 = vld [vmem:[%s1005_s30 + $0x20] sm:$0xff]  ;;  %v1069_v21 = vld [vmem:[%s1005_s30 + $0x28] sm:$0xff]  ;;  %v1100_v44 = vunpack.c.3.s8 %v1017_v0  ;;  %v1103_v45 = vunpack.c.3.s8 %v1022_v2  ;;  %s498_s19 = sshll.u32 %s200_s4, 4  ;;  %s485_s29 = scalar_lea.sflag [#allocation4], %s1001_s7  ;;  %s1172_s19 = int_to_ptr.vmem [resolvable:$true] %s498_s19 }
  0x5a   : > { %vm236_vm0 = vcmp.eq.s32.totalorder %v1025_v3, 4  ;;  %vm228_vm1 = vcmp.eq.s32.totalorder %v1025_v3, 3  ;;  %vm238_vm2 = vcmp.eq.s32.totalorder %v1028_v4, 4  ;;  %vm237_vm3 = vcmp.eq.s32.totalorder %v1034_v6, 4  ;;  %v1094_v42 = vld [vmem:[%s1005_s30 + $0x30] sm:$0xff]  ;;  %v1097_v43 = vld [vmem:[%s1005_s30 + $0x38] sm:$0xff] }
  0x5b   : > { %v312_v10 = vsel %vm236_vm0, %v1020_v1, 0.0  ;;  %vm229_vm4 = vcmp.eq.s32.totalorder %v1034_v6, 3  ;;  %v313_v13 = vsel %vm237_vm3, %v1031_v5, 0.0  ;;  %v292_v14 = vsel %vm228_vm1, %v1020_v1, 0.0  ;;  %s769_s6 = scalar_lea.vmem %s1172_s19, 128  ;;  %p1227_p1 = scmp.ne.s32.totalorder %s1221_s21, 0 }
  0x5c   : > { %v293_v15 = vsel %vm229_vm4, %v1031_v5, 0.0  ;;  %vm239_vm5 = vcmp.eq.s32.totalorder %v1037_v7, 4  ;;  %v320_v16 = vadd.f32 %v313_v13, %v312_v10  ;;  %v314_v18 = vsel %vm238_vm2, %v1042_v8, 0.0  ;;  %p770_p13 = scmp.ne.s32.totalorder %s1172_s19, %s769_s6  ;;  %s845_s13 = smov [#allocation7]  }
  0x5d   : > { %v300_v17 = vadd.f32 %v293_v15, %v292_v14  ;;  %v315_v20 = vsel %vm239_vm5, %v1052_v11, 0.0  ;;  %vm230_vm6 = vcmp.eq.s32.totalorder %v1028_v4, 3  ;;  %vm231_vm7 = vcmp.eq.s32.totalorder %v1037_v7, 3  ;;  %s773_s14 = sshll.u32 %s845_s13, 4  ;;  %s774_s14 = int_to_ptr.vmem [resolvable:$false] %s773_s14 }
  0x5e   : > { %321 = vadd.xlane.f32.xlu1 %v320_v16  ;;  %v323_v22 = vadd.f32 %v315_v20, %v314_v18  ;;  %v294_v23 = vsel %vm230_vm6, %v1042_v8, 0.0  ;;  %v295_v24 = vsel %vm231_vm7, %v1052_v11, 0.0  ;;  %vm240_vm8 = vcmp.eq.s32.totalorder %v1046_v9, 4  ;;  %p771_p11 = pnand %p770_p13, %p1227_p1  ;;  %s775_s16 = scalar_lea.vmem %s774_s14, 256 }
  0x5f   : > { %301 = vadd.xlane.f32.xlu0 %v300_v17  ;;  %v303_v25 = vadd.f32 %v295_v24, %v294_v23  ;;  %vm241_vm9 = vcmp.eq.s32.totalorder %v1055_v12, 4  ;;  %v316_v26 = vsel %vm240_vm8, %v1063_v19, 0.0  ;;  %vm232_vm10 = vcmp.eq.s32.totalorder %v1046_v9, 3  ;;  %p776_p5 = scmp.lt.s32.totalorder %s1172_s19, %s774_s14  ;;  %p777_p7 = scmp.lt.s32.totalorder %s775_s16, %s769_s6 }
  0x60   : > { %v317_v27 = vsel %vm241_vm9, %v1069_v21, 0.0  ;;  %vm233_vm11 = vcmp.eq.s32.totalorder %v1055_v12, 3  ;;  %v296_v28 = vsel %vm232_vm10, %v1063_v19, 0.0  ;;  %vm222_vm12 = vcmp.lt.s32.totalorder %v1028_v4, 3  ;;  %p772_p4 = pneg %p771_p11 }
  0x61   : > { %v297_v29 = vsel %vm233_vm11, %v1069_v21, 0.0  ;;  %v326_v30 = vadd.f32 %v317_v27, %v316_v26  ;;  %vm223_vm13 = vcmp.lt.s32.totalorder %v1037_v7, 3  ;;  %v338_v32 = vsel %vm222_vm12, %v1042_v8, 0.0  ;;  %p778_p9 = por %p777_p7, %p776_p5 }
  0x62   : > { %324 = vadd.xlane.f32.xlu1 %v323_v22  ;;  %v306_v31 = vadd.f32 %v297_v29, %v296_v28  ;;  %v339_v33 = vsel %vm223_vm13, %v1052_v11, 0.0  ;;  %vm220_vm14 = vcmp.lt.s32.totalorder %v1025_v3, 3  ;;  %vm221_vm15 = vcmp.lt.s32.totalorder %v1034_v6, 3 }
  0x63   : > { %304 = vadd.xlane.f32.xlu0 %v303_v25  ;;  %v336_v34 = vsel %vm220_vm14, %v1020_v1, 0.0  ;;  %v337_v35 = vsel %vm221_vm15, %v1031_v5, 0.0  ;;  %v347_v36 = vadd.f32 %v339_v33, %v338_v32  ;;  %vm374_vm0 = vcmp.ge.s32.totalorder %v1028_v4, 1  ;;  %p779_p3 = pnand %p778_p9, %p772_p4 }
  0x64   : > { %v344_v37 = vadd.f32 %v337_v35, %v336_v34  ;;  %vm375_vm1 = vcmp.ge.s32.totalorder %v1037_v7, 1  ;;  %v382_v38 = vsel %vm374_vm0, %v338_v32, 0.0  ;;  %vm372_vm2 = vcmp.ge.s32.totalorder %v1025_v3, 1 }
  0x65   : > { %v383_v39 = vsel %vm375_vm1, %v339_v33, 0.0  ;;  %vm373_vm3 = vcmp.ge.s32.totalorder %v1034_v6, 1  ;;  %v380_v40 = vsel %vm372_vm2, %v336_v34, 0.0  ;;  %vm224_vm4 = vcmp.lt.s32.totalorder %v1046_v9, 3 }
  0x66   : > { %327 = vadd.xlane.f32.xlu1 %v326_v30  ;;  %v381_v41 = vsel %vm373_vm3, %v337_v35, 0.0  ;;  %v391_v46 = vadd.f32 %v383_v39, %v382_v38  ;;  %vm225_vm5 = vcmp.lt.s32.totalorder %v1055_v12, 3  ;;  %vm242_vm6 = vcmp.eq.s32.totalorder %v1100_v44, 4 }
  0x67   : > { %307 = vadd.xlane.f32.xlu0 %v306_v31  ;;  %v388_v47 = vadd.f32 %v381_v41, %v380_v40  ;;  %vm243_vm7 = vcmp.eq.s32.totalorder %v1103_v45, 4  ;;  %vm234_vm8 = vcmp.eq.s32.totalorder %v1100_v44, 3  ;;  %vm235_vm9 = vcmp.eq.s32.totalorder %v1103_v45, 3 }
  0x68   : > { %v318_v48 = vsel %vm242_vm6, %v1094_v42, 0.0  ;;  %v319_v49 = vsel %vm243_vm7, %v1097_v43, 0.0  ;;  %v298_v50 = vsel %vm234_vm8, %v1094_v42, 0.0  ;;  %v299_v51 = vsel %vm235_vm9, %v1097_v43, 0.0 }
  0x69   : > { %v340_v52 = vsel %vm224_vm4, %v1063_v19, 0.0  ;;  %v341_v53 = vsel %vm225_vm5, %v1069_v21, 0.0  ;;  %vm376_vm10 = vcmp.ge.s32.totalorder %v1046_v9, 1  ;;  %vm377_vm11 = vcmp.ge.s32.totalorder %v1055_v12, 1 }
  0x6a   : > { %348 = vadd.xlane.f32.xlu1 %v347_v36  ;;  %v329_v54 = vadd.f32 %v319_v49, %v318_v48  ;;  %v309_v55 = vadd.f32 %v299_v51, %v298_v50  ;;  %v384_v56 = vsel %vm376_vm10, %v340_v52, 0.0  ;;  %v385_v57 = vsel %vm377_vm11, %v341_v53, 0.0 }
  0x6b   : > { %345 = vadd.xlane.f32.xlu0 %v344_v37  ;;  %vm418_vm12 = vcmp.ge.s32.totalorder %v1028_v4, 2  ;;  %vm419_vm13 = vcmp.ge.s32.totalorder %v1037_v7, 2  ;;  %vm416_vm14 = vcmp.ge.s32.totalorder %v1025_v3, 2  ;;  %vm417_vm15 = vcmp.ge.s32.totalorder %v1034_v6, 2 }
  0x6c   : > { %vm226_vm0 = vcmp.lt.s32.totalorder %v1100_v44, 3  ;;  %vm227_vm1 = vcmp.lt.s32.totalorder %v1103_v45, 3  ;;  %v394_v58 = vadd.f32 %v385_v57, %v384_v56  ;;  %v350_v59 = vadd.f32 %v341_v53, %v340_v52 }
  0x6d   : > { %v426_v60 = vsel %vm418_vm12, %v338_v32, 0.0  ;;  %v427_v61 = vsel %vm419_vm13, %v339_v33, 0.0  ;;  %v424_v62 = vsel %vm416_vm14, %v336_v34, 0.0  ;;  %v425_v63 = vsel %vm417_vm15, %v337_v35, 0.0 }
  0x6e   : > { %392 = vadd.xlane.f32.xlu1 %v391_v46  ;;  %v342_v0 = vsel %vm226_vm0, %v1094_v42, 0.0  ;;  %v343_v2 = vsel %vm227_vm1, %v1097_v43, 0.0  ;;  %vm378_vm2 = vcmp.ge.s32.totalorder %v1100_v44, 1  ;;  %vm379_vm3 = vcmp.ge.s32.totalorder %v1103_v45, 1 }
  0x6f   : > { %389 = vadd.xlane.f32.xlu0 %v388_v47  ;;  %v435_v10 = vadd.f32 %v427_v61, %v426_v60  ;;  %v432_v13 = vadd.f32 %v425_v63, %v424_v62  ;;  %v386_v14 = vsel %vm378_vm2, %v342_v0, 0.0  ;;  %v387_v15 = vsel %vm379_vm3, %v343_v2, 0.0 }
  0x70   : > { %vm422_vm4 = vcmp.ge.s32.totalorder %v1100_v44, 2  ;;  %vm423_vm5 = vcmp.ge.s32.totalorder %v1103_v45, 2  ;;  %vm420_vm6 = vcmp.ge.s32.totalorder %v1046_v9, 2  ;;  %vm421_vm7 = vcmp.ge.s32.totalorder %v1055_v12, 2 }
  0x71   : > { %v397_v16 = vadd.f32 %v387_v15, %v386_v14  ;;  %v353_v17 = vadd.f32 %v343_v2, %v342_v0  ;;  %v430_v18 = vsel %vm422_vm4, %v342_v0, 0.0  ;;  %v431_v20 = vsel %vm423_vm5, %v343_v2, 0.0 }
  0x72   : > { %330 = vadd.xlane.f32.xlu1 %v329_v54  ;;  %v428_v22 = vsel %vm420_vm6, %v340_v52, 0.0  ;;  %v429_v23 = vsel %vm421_vm7, %v341_v53, 0.0  ;;  %v441_v24 = vadd.f32 %v431_v20, %v430_v18  ;;  %669 = vlog2.f32 %v1031_v5 }
  0x73   : > { %310 = vadd.xlane.f32.xlu0 %v309_v55  ;;  %v438_v25 = vadd.f32 %v429_v23, %v428_v22  ;;  %671 = vlog2.f32 %v1020_v1  ;;  %vm260_vm8 = vcmp.le.s32.totalorder %v1025_v3, 3  ;;  %vm261_vm9 = vcmp.le.s32.totalorder %v1034_v6, 3 }
  0x74   : > { %673 = vlog2.f32 %v1042_v8  ;;  %vm262_vm10 = vcmp.le.s32.totalorder %v1028_v4, 3  ;;  %vm263_vm11 = vcmp.le.s32.totalorder %v1037_v7, 3  ;;  %vm264_vm12 = vcmp.le.s32.totalorder %v1046_v9, 3 }
  0x75   : > { %675 = vlog2.f32 %v1052_v11  ;;  %vm265_vm13 = vcmp.le.s32.totalorder %v1055_v12, 3  ;;  %vm266_vm14 = vcmp.le.s32.totalorder %v1100_v44, 3  ;;  %vm267_vm15 = vcmp.le.s32.totalorder %v1103_v45, 3 }
  0x76   : > { %395 = vadd.xlane.f32.xlu1 %v394_v58  ;;  %677 = vlog2.f32 %v1063_v19  ;;  %vm464_vm0 = vcmask 7168  }
  0x77   : > { %351 = vadd.xlane.f32.xlu0 %v350_v59  ;;  %679 = vlog2.f32 %v1069_v21 }
  0x78   : > { %681 = vlog2.f32 %v1094_v42 }
  0x79   : > { %683 = vlog2.f32 %v1097_v43 }
  0x7a   : > { %436 = vadd.xlane.f32.xlu1 %v435_v10 }
  0x7b   : > { %433 = vadd.xlane.f32.xlu0 %v432_v13 }
  0x7c   : > { %v670_v26 = vpop.eup %669 }
  0x7d   : > { %v672_v27 = vpop.eup %671  ;;  %v247_v28 = vmul.f32 0.6931472, %v670_v26 }
  0x7e   : > { %398 = vadd.xlane.f32.xlu1 %v397_v16  ;;  %v245_v29 = vmul.f32 0.6931472, %v672_v27  ;;  %v674_v30 = vpop.eup %673 }
  0x7f   : > { %354 = vadd.xlane.f32.xlu0 %v353_v17  ;;  %v269_v1 = vsel %vm261_vm9, %v247_v28, 0.0  ;;  %v249_v8 = vmul.f32 0.6931472, %v674_v30  ;;  %v676_v31 = vpop.eup %675 }
  0x80   : > { %v268_v5 = vsel %vm260_vm8, %v245_v29, 0.0  ;;  %v678_v11 = vpop.eup %677  ;;  %v251_v21 = vmul.f32 0.6931472, %v676_v31 }
  0x81   : > { %v276_v19 = vadd.f32 %v269_v1, %v268_v5  ;;  %v270_v32 = vsel %vm262_vm10, %v249_v8, 0.0  ;;  %v680_v33 = vpop.eup %679  ;;  %v253_v34 = vmul.f32 0.6931472, %v678_v11 }
  0x82   : > { %442 = vadd.xlane.f32.xlu1 %v441_v24  ;;  %v271_v6 = vsel %vm263_vm11, %v251_v21, 0.0  ;;  %v255_v36 = vmul.f32 0.6931472, %v680_v33  ;;  %v682_v38 = vpop.eup %681 }
  0x83   : > { %439 = vadd.xlane.f32.xlu0 %v438_v25  ;;  %v277_v3 = vadd.f32 %v276_v19, %v270_v32  ;;  %v272_v37 = vsel %vm264_vm12, %v253_v34, 0.0  ;;  %v257_v40 = vmul.f32 0.6931472, %v682_v38  ;;  %v684_v41 = vpop.eup %683 }
  0x84   : > { %v273_v4 = vsel %vm265_vm13, %v255_v36, 0.0  ;;  %v259_v43 = vmul.f32 0.6931472, %v684_v41 }
  0x85   : > { %v278_v35 = vadd.f32 %v277_v3, %v271_v6  ;;  %v274_v7 = vsel %vm266_vm14, %v257_v40, 0.0 }
  0x86   : > { %v275_v47 = vsel %vm267_vm15, %v259_v43, 0.0 }
  0x87   : > { %v279_v39 = vadd.f32 %v278_v35, %v272_v37 }
  0x89   : > { %v280_v42 = vadd.f32 %v279_v39, %v273_v4 }
  0x8b   : > { %v281_v46 = vadd.f32 %v280_v42, %v274_v7 }
  0x8d   : > { %v282_v9 = vadd.f32 %v281_v46, %v275_v47 }
  0x8f   : > { %283 = vadd.xlane.f32.xlu0 %v282_v9 }
  0xeb   : > { %v1149_v48 = vpop.xlane.xlu1 %321 }
  0xec   : > { %v302_v49 = vpop.xlane.xlu0 %301 }
  0xed   : > { %v332_v45 = vadd.f32 %v1149_v48, %v302_v49 }
  0xef   : > { %v1151_v50 = vpop.xlane.xlu1 %324 }
  0xf0   : > { %v305_v12 = vpop.xlane.xlu0 %304 }
  0xf1   : > { %v333_v56 = vadd.f32 %v1151_v50, %v305_v12 }
  0xf3   : > { %v1153_v51 = vpop.xlane.xlu1 %327 }
  0xf4   : > { %v308_v52 = vpop.xlane.xlu0 %307 }
  0xf5   : > { %v334_v2 = vadd.f32 %v1153_v51, %v308_v52 }
  0xf7   : > { %v349_v53 = vpop.xlane.xlu1 %348 }
  0xf8   : > { %v346_v44 = vpop.xlane.xlu0 %345  ;;  %v357_v61 = vadd.f32 %v349_v53, %v333_v56 }
  0xf9   : > { %v356_v62 = vadd.f32 %v346_v44, %v332_v45 }
  0xfb   : > { %v393_v54 = vpop.xlane.xlu1 %392 }
  0xfc   : > { %v390_v55 = vpop.xlane.xlu0 %389  ;;  %v401_v59 = vadd.f32 %v393_v54, %v333_v56 }
  0xfd   : > { %v400_v60 = vadd.f32 %v390_v55, %v332_v45 }
  0xfe   : > { %685 = vlog2.f32 %v401_v59 }
  0xff   : > { %v1157_v57 = vpop.xlane.xlu1 %330  ;;  %687 = vlog2.f32 %v400_v60 }
 0x100   : > { %v311_v58 = vpop.xlane.xlu0 %310  ;;  %689 = vlog2.f32 %v357_v61 }
 0x101   : > { %691 = vlog2.f32 %v356_v62  ;;  %v335_v18 = vadd.f32 %v1157_v57, %v311_v58 }
 0x103   : > { %v396_v63 = vpop.xlane.xlu1 %395 }
 0x104   : > { %v352_v0 = vpop.xlane.xlu0 %351  ;;  %v402_v14 = vadd.f32 %v396_v63, %v334_v2 }
 0x105   : > { %v358_v17 = vadd.f32 %v352_v0, %v334_v2 }
 0x107   : > { %v437_v10 = vpop.xlane.xlu1 %436 }
 0x108   : > { %v434_v13 = vpop.xlane.xlu0 %433  ;;  %v445_v15 = vadd.f32 %v437_v10, %v333_v56  ;;  %v686_v25 = vpop.eup %685 }
 0x109   : > { %v444_v16 = vadd.f32 %v434_v13, %v332_v45  ;;  %v688_v26 = vpop.eup %687  ;;  %v407_v8 = vmul.f32 0.6931472, %v686_v25 }
 0x10a   : > { %693 = vlog2.f32 %v445_v15  ;;  %v690_v29 = vpop.eup %689  ;;  %v405_v31 = vmul.f32 0.6931472, %v688_v26 }
 0x10b   : > { %695 = vlog2.f32 %v444_v16  ;;  %v399_v20 = vpop.xlane.xlu1 %398  ;;  %v692_v5 = vpop.eup %691  ;;  %v363_v19 = vmul.f32 0.6931472, %v690_v29 }
 0x10c   : > { %v355_v22 = vpop.xlane.xlu0 %354  ;;  %697 = vlog2.f32 %v402_v14  ;;  %v403_v23 = vadd.f32 %v399_v20, %v335_v18  ;;  %v361_v21 = vmul.f32 0.6931472, %v692_v5 }
 0x10d   : > { %v359_v24 = vadd.f32 %v355_v22, %v335_v18  ;;  %699 = vlog2.f32 %v358_v17  ;;  %v413_v34 = vadd.f32 %v407_v8, %v363_v19 }
 0x10e   : > { %701 = vlog2.f32 %v403_v23  ;;  %v412_v6 = vadd.f32 %v405_v31, %v361_v21 }
 0x10f   : > { %703 = vlog2.f32 %v359_v24  ;;  %v443_v27 = vpop.xlane.xlu1 %442 }
 0x110   : > { %v440_v28 = vpop.xlane.xlu0 %439  ;;  %v447_v30 = vadd.f32 %v443_v27, %v335_v18 }
 0x111   : > { %v446_v1 = vadd.f32 %v440_v28, %v334_v2 }
 0x112   : > { %705 = vlog2.f32 %v447_v30 }
 0x113   : > { %707 = vlog2.f32 %v446_v1 }
 0x114   : > { %v694_v11 = vpop.eup %693 }
 0x115   : > { %v696_v32 = vpop.eup %695  ;;  %v451_v33 = vmul.f32 0.6931472, %v694_v11 }
 0x116   : > { %v698_v3 = vpop.eup %697  ;;  %v449_v35 = vmul.f32 0.6931472, %v696_v32 }
 0x117   : > { %v700_v36 = vpop.eup %699  ;;  %v457_v38 = vadd.f32 %v451_v33, %v413_v34  ;;  %v409_v41 = vmul.f32 0.6931472, %v698_v3 }
 0x118   : > { %v702_v37 = vpop.eup %701  ;;  %v456_v39 = vadd.f32 %v449_v35, %v412_v6  ;;  %v365_v42 = vmul.f32 0.6931472, %v700_v36 }
 0x119   : > { %v704_v40 = vpop.eup %703  ;;  %v411_v4 = vmul.f32 0.6931472, %v702_v37  ;;  %v461_v46 = vadd.f32 %v457_v38, %v1151_v50 }
 0x11a   : > { %v367_v43 = vmul.f32 0.6931472, %v704_v40  ;;  %v460_v47 = vadd.f32 %v456_v39, %v1149_v48  ;;  %v414_v52 = vadd.f32 %v409_v41, %v365_v42 }
 0x11b   : > { %v466_v56 = vsel %vm464_vm0, %v461_v46, 0.0 }
 0x11c   : > { %v706_v7 = vpop.eup %705  ;;  %v415_v49 = vadd.f32 %v411_v4, %v367_v43  ;;  %v465_v55 = vsel %vm464_vm0, %v460_v47, 0.0  ;;  %v284_v48 = vpop.xlane.xlu0 %283 }
 0x11d   : > { %v708_v9 = vpop.eup %707  ;;  %v455_v12 = vmul.f32 0.6931472, %v706_v7  ;;  %v467_v59 = vadd.f32 %v466_v56, %v465_v55  ;;  %v285_v63 = vrot.slane %v284_v48, 4 }
 0x11e   : > { %v453_v53 = vmul.f32 0.6931472, %v708_v9 }
 0x11f   : > { %v459_v44 = vadd.f32 %v455_v12, %v415_v49  ;;  %v286_v0 = vadd.f32 %v285_v63, %v284_v48 }
 0x120   : > { %v458_v54 = vadd.f32 %v453_v53, %v414_v52 }
 0x121   : > { %v463_v58 = vadd.f32 %v459_v44, %v1157_v57  ;;  %v287_v2 = vrot.slane %v286_v0, 2 }
 0x122   : > { %v462_v45 = vadd.f32 %v458_v54, %v1153_v51 }
 0x123   : > { %v470_v50 = vsel %vm464_vm0, %v463_v58, 0.0  ;;  %v288_v10 = vadd.f32 %v287_v2, %v286_v0 }
 0x124   : > { %v468_v60 = vsel %vm464_vm0, %v462_v45, 0.0 }
 0x125   : > { %v469_v61 = vadd.f32 %v468_v60, %v467_v59  ;;  %v289_v13 = vrot.slane %v288_v10, 1 }
 0x127   : > { %v471_v62 = vadd.f32 %v470_v50, %v469_v61  ;;  %v290_v14 = vadd.f32 %v289_v13, %v288_v10 }
 0x129   : > { %472 = vadd.xlane.f32.xlu1 %v471_v62  ;;  %612 = vpush %v290_v14 }
 0x15a   : > { %s613_s17 = spop %612 }
 0x1b6   : > { %v473_v15 = vpop.xlane.xlu1 %472 }
 0x1b7   : > { %v474_v51 = vrot.slane %v473_v15, 4 }
 0x1b9   : > { %v475_v16 = vadd.f32 %v474_v51, %v473_v15 }
 0x1bb   : > { %v476_v57 = vrot.slane %v475_v16, 2 }
 0x1bd   : > { %v477_v17 = vadd.f32 %v476_v57, %v475_v16 }
 0x1bf   : > { %v478_v18 = vrot.slane %v477_v17, 1 }
 0x1c1   : > { %v479_v20 = vadd.f32 %v478_v18, %v477_v17 }
 0x1c3   : > { %614 = vpush %v479_v20 }
 0x1f4   : > { %s615_s24 = spop %614 }
 0x1f5   : > { %s481_s25 = ssub.f32 %s615_s24, %s613_s17 }
 0x1f7   : > { %v482_v22 = vstv %s481_s25 }
 0x1f8   : > { %483 = vst [vmem:[%s200_s4] sm:$0xff] %v482_v22 }
 0x1f9   : > { %782 = shalt.err (!%p779_p3)
}
 0x1fa   : > { %s783_s7 = scalar_lea.hbm %s1170_s27, 128  ;;  %s787_s5 = scalar_lea.hbm %s1216_s2, 256 }
 0x1fb   : > { %p784_p12 = scmp.ne.s32.totalorder %s1170_s27, %s783_s7  ;;  %p788_p2 = scmp.lt.u32.totalorder %s1170_s27, %s1216_s2 }
 0x1fc   : > { %p789_p10 = scmp.lt.u32.totalorder %s787_s5, %s783_s7  ;;  %p791_p13 = scmp.lt.u32.totalorder %s783_s7, %s1170_s27 }
 0x1fd   : > { %p785_p8 = pnand %p784_p12, %p1227_p1 }
 0x1fe   : > { %p790_p6 = por %p789_p10, %p788_p2 }
 0x1ff   : > { %p786_p0 = pneg %p785_p8 }
 0x200   : > { %p792_p11 = por %p791_p13, %p790_p6 }
 0x202   : > { %p793_p4 = pnand %p792_p11, %p786_p0 }
 0x204   : > { %796 = shalt.err (!%p793_p4)
}
 0x205   : > { %620 = dma.vmem_to_hbm [thread:$0]  (%p1227_p1), %s1172_s19, 128, %s1170_s27, %s485_s29  }
 0x206 PF: > { %s510_s17 = sand.u32 1, %s827_s9   ;;  %p1228_p5 = scmp.ne.s32.totalorder %s1222_s22, 0 }
 0x207   : > { %p1229_p7 = scmp.ge.s32.totalorder %s839_s12, 2  ;;  %s511_s28 = scalar_lea.sflag [#allocation4], %s510_s17 }
 0x209   : > { %p630_p9 = pnand %p1229_p7, %p1228_p5 }
 0x20b   : > { %822 = dma.done.wait (!%p630_p9), %s511_s28, 128  }
 0x20c   : > { %824 = vsyncadd (!%p630_p9), %s511_s28, 4294967168  ;;  %p18_p3 = scmp.ge.s32.totalorder %s886_s15, 4   ;;  %s1230_s9 = smov %s831_s10 }
 0x20d   : > { %s1231_s10 = smov %s835_s11  ;;  %s1232_s11 = smov %s898_s18 }
 0x20e   : > { %s1233_s12 = smov %s886_s15  ;;  %20 = sbr.rel (!%p18_p3) target bundleno = 7 (0x7), region = 86 }
 0x215   :  { %516 = vsyncpa [#allocation3], 1 }
 0x216   :  { %518 = vsyncpa [#allocation3 + $0x1], 1 }
 0x217   :  { %519 = vsyncpa [#allocation6], 1 }
 0x218   :  { %521 = vsyncpa [#allocation6 + $0x1], 1 }
 0x219   :  { %522 = vsyncpa [#allocation4], 1 }
 0x21a   :  { %524 = vsyncpa [#allocation4 + $0x1], 1 }

</bundles_post_ra>
